<compile_context>
chip_gen: v5e
topology: v5e:2x2
jax: 0.10.0
libtpu: 0.0.40
codegen_flags: <defaults>
</compile_context>

<pallas_src>
import functools

import jax
import jax.numpy as jnp
from jax import lax
from jax.experimental import pallas as pl
from jax.experimental.pallas import tpu as pltpu


def _round_up(x, m):
    return ((x + m - 1) // m) * m


def _flash_attn_kernel(*refs, has_bias):
    if has_bias:
        q_ref, k_ref, v_ref, bias_ref, o_ref, m_sc, l_sc, acc_sc = refs
    else:
        q_ref, k_ref, v_ref, o_ref, m_sc, l_sc, acc_sc = refs
        bias_ref = None

    ki = pl.program_id(2)

    @pl.when(ki == 0)
    def _():
        m_sc[...] = jnp.full_like(m_sc, -jnp.inf)
        l_sc[...] = jnp.zeros_like(l_sc)
        acc_sc[...] = jnp.zeros_like(acc_sc)

    q = q_ref[...]          # (tq, D)  or (bb, tq, D) on the tiny-batch path
    k = k_ref[...]          # (tk, D)  or (bb, tk, D)
    v = v_ref[...]          # (tk, Dv) or (bb, tk, Dv)
    batched = q.ndim == 3

    # scores = Q @ K^T, contracting D of both operands (no XLU transpose of K).
    if batched:
        s = jnp.einsum("bqd,bkd->bqk", q, k, preferred_element_type=jnp.float32)
    else:
        s = lax.dot_general(q, k, (((1,), (1,)), ((), ())),
                            preferred_element_type=jnp.float32)   # (tq, tk)

    if bias_ref is not None:
        # Precomputed additive key-padding bias: 0 for valid, -inf for padded.
        b = bias_ref[...]                                         # (1, tk)
        s = s + (b[None] if batched else b)

    # Online (streaming) softmax over the key axis; f32 throughout.
    m_prev = m_sc[...]
    m_new = jnp.maximum(m_prev, jnp.max(s, axis=-1, keepdims=True))
    alpha = jnp.exp(m_prev - m_new)
    p = jnp.exp(s - m_new)

    l_sc[...] = alpha * l_sc[...] + jnp.sum(p, axis=-1, keepdims=True)

    p = p.astype(v.dtype)
    if batched:
        pv = jnp.einsum("bqk,bkd->bqd", p, v, preferred_element_type=jnp.float32)
    else:
        pv = jnp.dot(p, v, preferred_element_type=jnp.float32)
    acc_sc[...] = alpha * acc_sc[...] + pv
    m_sc[...] = m_new

    # dropout(p=0.0) is the identity; nothing to do.

    @pl.when(ki == pl.num_programs(2) - 1)
    def _():
        inv_l = pl.reciprocal(l_sc[...], approx=False)   # once per q tile: exact
        o_ref[...] = (acc_sc[...] * inv_l).astype(o_ref.dtype)


def dot_attention(q, k, v, scale=None, attn_mask=None, *,
                  block_q=256, block_k=256, mxu_dtype=jnp.bfloat16,
                  vmem_budget_bytes=36 * 1024 * 1024,
                  vmem_limit_bytes=48 * 1024 * 1024):
    """Pallas TPU implementation of the PyTorch `dot_attention.forward`."""
    assert attn_mask is None, "attn_mask not supported in this kernel"
    # TODO(synk): attn_mask (masked_fill with -inf) path not wired; the module
    # is exercised with attn_mask=None in this setup.

    B, Lq, D = q.shape
    Bk, Lk, Dk = k.shape
    Bv, Lv, Dv = v.shape
    assert B == Bk == Bv and D == Dk and Lk == Lv

    out_dtype = q.dtype
    if not scale:            # mirror PyTorch `if scale:` truthiness (None/0 -> off)
        scale = None
    if mxu_dtype is None:    # "no cast" -> keep the input dtype on the MXU
        mxu_dtype = q.dtype
    itemsize = jnp.dtype(mxu_dtype).itemsize

    # Fold scale into Q (Lq*D multiplies, before the narrowing cast) and cast
    # all operands to the MXU dtype in the wrapper, not per ki step in-kernel.
    qc = q if scale is None else q * jnp.asarray(scale, q.dtype)
    qc = qc.astype(mxu_dtype)
    kc = k.astype(mxu_dtype)
    vc = v.astype(mxu_dtype)

    # ---- tiling / residency decisions -------------------------------------
    # Collapse the whole problem into one grid step only when truly tiny
    # (keeps >= 2 parallel steps for mid-size shapes so both v7x TCs get work).
    tiny = (Lq <= 64 and Lk <= 64 and B <= 8 and D <= 256 and Dv <= 256)
    bb = B if tiny else 1

    tq = Lq if Lq <= block_q else block_q
    Lq_pad = _round_up(Lq, tq)

    # Full K/V VMEM residency when it fits the conservative budget: K/V blocks
    # then stay constant across qi and are streamed once per batch element.
    out_isz = jnp.dtype(out_dtype).itemsize
    kv_resident_bytes = 2 * bb * Lk * (D + Dv) * itemsize       # 2x: double buffer
    other_bytes = (2 * bb * tq * D * itemsize                   # Q tiles
                   + 2 * bb * tq * Dv * out_isz                 # output tiles
                   + bb * tq * (Dv + 16) * 4)                   # f32 scratch
    if Lk <= block_k or kv_resident_bytes + other_bytes <= vmem_budget_bytes:
        tk = Lk
    else:
        tk = block_k
    Lk_pad = _round_up(Lk, tk)

    def pad_seq(x, lpad):
        p = lpad - x.shape[1]
        return x if p == 0 else jnp.pad(x, ((0, 0), (0, p), (0, 0)))

    qp = pad_seq(qc, Lq_pad)
    kp = pad_seq(kc, Lk_pad)
    vp = pad_seq(vc, Lk_pad)

    need_bias = Lk_pad != Lk
    squeeze = bb == 1
    bdim = (None,) if squeeze else (bb,)     # None => squeezed batch dim

    in_specs = [
        pl.BlockSpec(bdim + (tq, D), lambda b, qi, ki: (b, qi, 0)),
        pl.BlockSpec(bdim + (tk, D), lambda b, qi, ki: (b, ki, 0)),
        pl.BlockSpec(bdim + (tk, Dv), lambda b, qi, ki: (b, ki, 0)),
    ]
    inputs = [qp, kp, vp]
    if need_bias:
        bias = jnp.where(jnp.arange(Lk_pad) < Lk, 0.0, -jnp.inf)
        bias = bias.astype(jnp.float32).reshape(1, Lk_pad)
        in_specs.append(pl.BlockSpec((1, tk), lambda b, qi, ki: (0, ki)))
        inputs.append(bias)

    out_spec = pl.BlockSpec(bdim + (tq, Dv), lambda b, qi, ki: (b, qi, 0))

    if squeeze:
        scratch_shapes = [pltpu.VMEM((tq, 1), jnp.float32),      # running max
                          pltpu.VMEM((tq, 1), jnp.float32),      # running sum
                          pltpu.VMEM((tq, Dv), jnp.float32)]     # accumulator
    else:
        scratch_shapes = [pltpu.VMEM((bb, tq, 1), jnp.float32),
                          pltpu.VMEM((bb, tq, 1), jnp.float32),
                          pltpu.VMEM((bb, tq, Dv), jnp.float32)]

    grid = (B // bb, Lq_pad // tq, Lk_pad // tk)

    kernel = functools.partial(_flash_attn_kernel, has_bias=need_bias)

    out = pl.pallas_call(
        kernel,
        out_shape=jax.ShapeDtypeStruct((B, Lq_pad, Dv), out_dtype),
        grid_spec=pltpu.PrefetchScalarGridSpec(
            num_scalar_prefetch=0,
            grid=grid,
            in_specs=in_specs,
            out_specs=out_spec,
            scratch_shapes=scratch_shapes,
        ),
        compiler_params=pltpu.CompilerParams(
            dimension_semantics=("parallel", "parallel", "arbitrary"),
            vmem_limit_bytes=vmem_limit_bytes),
    )(*inputs)

    if Lq_pad != Lq:
        out = out[:, :Lq, :]
    return out


def _reference(q, k, v, scale=None):
    s = jnp.einsum("bqd,bkd->bqk", q.astype(jnp.float32), k.astype(jnp.float32))
    if scale:
        s = s * scale
    attn = jax.nn.softmax(s, axis=2)
    return jnp.einsum("bqk,bkd->bqd", attn, v.astype(jnp.float32))


if __name__ == "__main__":
    key = jax.random.PRNGKey(0)
    kq, kk, kv = jax.random.split(key, 3)

    # Module-implied small shape: torch.bmm convention (B, L, D).
    B, Lq, Lk, D, Dv = 2, 8, 8, 32, 32
    q = jax.random.normal(kq, (B, Lq, D), dtype=jnp.float32)
    k = jax.random.normal(kk, (B, Lk, D), dtype=jnp.float32)
    v = jax.random.normal(kv, (B, Lk, Dv), dtype=jnp.float32)
    scale = 1.0 / (D ** 0.5)
    ref = _reference(q, k, v, scale=scale)

    # Default path: bf16 MXU operands, f32 softmax / accumulation.
    out = jax.block_until_ready(dot_attention(q, k, v, scale=scale))
    assert out.shape == (B, Lq, Dv)
    assert jnp.allclose(out, ref, atol=5e-2, rtol=5e-2), "mismatch (bf16 tiny)"

    # Exact f32-MXU path for tight parity with the PyTorch reference.
    out_f32 = jax.block_until_ready(
        dot_attention(q, k, v, scale=scale, mxu_dtype=None))
    assert jnp.allclose(out_f32, ref, atol=2e-3, rtol=2e-3), "mismatch (f32 tiny)"

    # Mid-size shape: K/V VMEM-resident, batch-parallel grid steps, 2-D path.
    B2, L2, D2, Dv2 = 2, 256, 64, 128
    q2 = jax.random.normal(kq, (B2, L2, D2), dtype=jnp.float32)
    k2 = jax.random.normal(kk, (B2, L2, D2), dtype=jnp.float32)
    v2 = jax.random.normal(kv, (B2, L2, Dv2), dtype=jnp.float32)
    ref2 = _reference(q2, k2, v2, scale=1.0 / (D2 ** 0.5))
    out2 = jax.block_until_ready(
        dot_attention(q2, k2, v2, scale=1.0 / (D2 ** 0.5)))
    assert jnp.allclose(out2, ref2, atol=5e-2, rtol=5e-2), "mismatch (resident)"

    # Forced-streaming path: zero residency budget + 128 tiles exercises the
    # multi-ki online softmax, the key-padding bias and the ragged Lq tail.
    B3, L3, D3, Dv3 = 2, 200, 64, 32
    q3 = jax.random.normal(kq, (B3, L3, D3), dtype=jnp.float32)
    k3 = jax.random.normal(kk, (B3, L3, D3), dtype=jnp.float32)
    v3 = jax.random.normal(kv, (B3, L3, Dv3), dtype=jnp.float32)
    ref3 = _reference(q3, k3, v3, scale=1.0 / (D3 ** 0.5))
    out3 = jax.block_until_ready(
        dot_attention(q3, k3, v3, scale=1.0 / (D3 ** 0.5),
                      block_q=128, block_k=128, vmem_budget_bytes=0))
    assert out3.shape == (B3, L3, Dv3)
    assert jnp.allclose(out3, ref3, atol=5e-2, rtol=5e-2), "mismatch (streamed)"

    print("KERNEL_OK")
</pallas_src>

<mosaic_0001>
module attributes {stable_mosaic.version = 11 : i64} {
  func.func @_flash_attn_kernel(%arg0: i32, %arg1: i32, %arg2: i32, %arg3: memref<2x8x32xbf16, #tpu.memory_space<vmem>>, %arg4: memref<2x8x32xbf16, #tpu.memory_space<vmem>>, %arg5: memref<2x8x32xbf16, #tpu.memory_space<vmem>>, %arg6: memref<2x8x32xf32, #tpu.memory_space<vmem>>, %arg7: memref<2x8x1xf32, #tpu.memory_space<vmem>>, %arg8: memref<2x8x1xf32, #tpu.memory_space<vmem>>, %arg9: memref<2x8x32xf32, #tpu.memory_space<vmem>>) attributes {dimension_semantics = [#tpu.dimension_semantics<parallel>, #tpu.dimension_semantics<parallel>, #tpu.dimension_semantics<arbitrary>], iteration_bounds = array<i64: 1, 1, 1>, scalar_prefetch = 0 : i64, scratch_operands = 3 : i64, tpu.core_type = #tpu.core_type<tc>, window_params = [{transform_indices = @transform_0, window_bounds = array<i64: 2, 8, 32>}, {transform_indices = @transform_1, window_bounds = array<i64: 2, 8, 32>}, {transform_indices = @transform_2, window_bounds = array<i64: 2, 8, 32>}, {transform_indices = @transform_3, window_bounds = array<i64: 2, 8, 32>}]} {
    %c0_i32 = arith.constant 0 : i32
    %0 = arith.cmpi eq, %arg2, %c0_i32 : i32
    %1 = arith.extui %0 : i1 to i32
    %c0_i32_0 = arith.constant 0 : i32
    %2 = arith.cmpi ne, %1, %c0_i32_0 : i32
    scf.if %2 {
      %cst_32 = arith.constant 0xFF800000 : f32
      %33 = vector.broadcast %cst_32 : f32 to vector<2x8x1xf32>
      %c0_33 = arith.constant 0 : index
      %c0_34 = arith.constant 0 : index
      %c0_35 = arith.constant 0 : index
      %34 = vector.load %arg7[%c0_33, %c0_34, %c0_35] : memref<2x8x1xf32, #tpu.memory_space<vmem>>, vector<2x8x1xf32>
      tpu.vector_store %arg7[%c0_33, %c0_34, %c0_35], %33 {strides = array<i32>} : memref<2x8x1xf32, #tpu.memory_space<vmem>>, vector<2x8x1xf32>,
      %cst_36 = arith.constant 0.000000e+00 : f32
      %35 = vector.broadcast %cst_36 : f32 to vector<2x8x1xf32>
      %c0_37 = arith.constant 0 : index
      %c0_38 = arith.constant 0 : index
      %c0_39 = arith.constant 0 : index
      %36 = vector.load %arg8[%c0_37, %c0_38, %c0_39] : memref<2x8x1xf32, #tpu.memory_space<vmem>>, vector<2x8x1xf32>
      tpu.vector_store %arg8[%c0_37, %c0_38, %c0_39], %35 {strides = array<i32>} : memref<2x8x1xf32, #tpu.memory_space<vmem>>, vector<2x8x1xf32>,
      %cst_40 = arith.constant 0.000000e+00 : f32
      %37 = vector.broadcast %cst_40 : f32 to vector<2x8x32xf32>
      %c0_41 = arith.constant 0 : index
      %c0_42 = arith.constant 0 : index
      %c0_43 = arith.constant 0 : index
      %38 = vector.load %arg9[%c0_41, %c0_42, %c0_43] : memref<2x8x32xf32, #tpu.memory_space<vmem>>, vector<2x8x32xf32>
      tpu.vector_store %arg9[%c0_41, %c0_42, %c0_43], %37 {strides = array<i32>} : memref<2x8x32xf32, #tpu.memory_space<vmem>>, vector<2x8x32xf32>,
    } else {
    }
    %c0 = arith.constant 0 : index
    %c0_1 = arith.constant 0 : index
    %c0_2 = arith.constant 0 : index
    %3 = vector.load %arg3[%c0, %c0_1, %c0_2] : memref<2x8x32xbf16, #tpu.memory_space<vmem>>, vector<2x8x32xbf16>
    %c0_3 = arith.constant 0 : index
    %c0_4 = arith.constant 0 : index
    %c0_5 = arith.constant 0 : index
    %4 = vector.load %arg4[%c0_3, %c0_4, %c0_5] : memref<2x8x32xbf16, #tpu.memory_space<vmem>>, vector<2x8x32xbf16>
    %c0_6 = arith.constant 0 : index
    %c0_7 = arith.constant 0 : index
    %c0_8 = arith.constant 0 : index
    %5 = vector.load %arg5[%c0_6, %c0_7, %c0_8] : memref<2x8x32xbf16, #tpu.memory_space<vmem>>, vector<2x8x32xbf16>
    "tpu.trace_start"() <{level = 10 : i32, message = "bqd,bkd->bqk"}> : () -> ()
    %cst = arith.constant dense<0.000000e+00> : vector<2x8x8xf32>
    %6 = tpu.matmul %3, %4, %cst {dimension_numbers = #tpu.dot_dimension_numbers<[2], [2], [1], [1], [0, 0, 0, 1, 1, 1], [0], [0]>} : vector<2x8x32xbf16>, vector<2x8x32xbf16>, vector<2x8x8xf32> -> vector<2x8x8xf32>
    "tpu.trace_stop"() : () -> ()
    %c0_9 = arith.constant 0 : index
    %c0_10 = arith.constant 0 : index
    %c0_11 = arith.constant 0 : index
    %7 = vector.load %arg7[%c0_9, %c0_10, %c0_11] : memref<2x8x1xf32, #tpu.memory_space<vmem>>, vector<2x8x1xf32>
    %cst_12 = arith.constant dense<0xFF800000> : vector<2x8xf32>
    %8 = vector.multi_reduction <maximumf>, %6, %cst_12 [2] : vector<2x8x8xf32> to vector<2x8xf32>
    %9 = vector.shape_cast %8 : vector<2x8xf32> to vector<2x8x1xf32>
    %10 = arith.maximumf %7, %9 : vector<2x8x1xf32>
    %11 = arith.subf %7, %10 : vector<2x8x1xf32>
    %12 = math.exp %11 : vector<2x8x1xf32>
    %13 = vector.broadcast %10 : vector<2x8x1xf32> to vector<2x8x8xf32>
    %14 = arith.subf %6, %13 : vector<2x8x8xf32>
    %15 = math.exp %14 : vector<2x8x8xf32>
    %c0_13 = arith.constant 0 : index
    %c0_14 = arith.constant 0 : index
    %c0_15 = arith.constant 0 : index
    %16 = vector.load %arg8[%c0_13, %c0_14, %c0_15] : memref<2x8x1xf32, #tpu.memory_space<vmem>>, vector<2x8x1xf32>
    %17 = arith.mulf %12, %16 : vector<2x8x1xf32>
    %cst_16 = arith.constant dense<0.000000e+00> : vector<2x8xf32>
    %18 = vector.multi_reduction <add>, %15, %cst_16 [2] : vector<2x8x8xf32> to vector<2x8xf32>
    %19 = vector.shape_cast %18 : vector<2x8xf32> to vector<2x8x1xf32>
    %20 = arith.addf %17, %19 : vector<2x8x1xf32>
    %c0_17 = arith.constant 0 : index
    %c0_18 = arith.constant 0 : index
    %c0_19 = arith.constant 0 : index
    %21 = vector.load %arg8[%c0_17, %c0_18, %c0_19] : memref<2x8x1xf32, #tpu.memory_space<vmem>>, vector<2x8x1xf32>
    tpu.vector_store %arg8[%c0_17, %c0_18, %c0_19], %20 {strides = array<i32>} : memref<2x8x1xf32, #tpu.memory_space<vmem>>, vector<2x8x1xf32>,
    %22 = arith.truncf %15 : vector<2x8x8xf32> to vector<2x8x8xbf16>
    "tpu.trace_start"() <{level = 10 : i32, message = "bqk,bkd->bqd"}> : () -> ()
    %cst_20 = arith.constant dense<0.000000e+00> : vector<2x8x32xf32>
    %23 = tpu.matmul %22, %5, %cst_20 {dimension_numbers = #tpu.dot_dimension_numbers<[2], [1], [1], [2], [0, 0, 0, 1, 1, 2], [0], [0]>} : vector<2x8x8xbf16>, vector<2x8x32xbf16>, vector<2x8x32xf32> -> vector<2x8x32xf32>
    "tpu.trace_stop"() : () -> ()
    %c0_21 = arith.constant 0 : index
    %c0_22 = arith.constant 0 : index
    %c0_23 = arith.constant 0 : index
    %24 = vector.load %arg9[%c0_21, %c0_22, %c0_23] : memref<2x8x32xf32, #tpu.memory_space<vmem>>, vector<2x8x32xf32>
    %25 = vector.broadcast %12 : vector<2x8x1xf32> to vector<2x8x32xf32>
    %26 = arith.mulf %25, %24 : vector<2x8x32xf32>
    %27 = arith.addf %26, %23 : vector<2x8x32xf32>
    %c0_24 = arith.constant 0 : index
    %c0_25 = arith.constant 0 : index
    %c0_26 = arith.constant 0 : index
    %28 = vector.load %arg9[%c0_24, %c0_25, %c0_26] : memref<2x8x32xf32, #tpu.memory_space<vmem>>, vector<2x8x32xf32>
    tpu.vector_store %arg9[%c0_24, %c0_25, %c0_26], %27 {strides = array<i32>} : memref<2x8x32xf32, #tpu.memory_space<vmem>>, vector<2x8x32xf32>,
    %c0_27 = arith.constant 0 : index
    %c0_28 = arith.constant 0 : index
    %c0_29 = arith.constant 0 : index
    %29 = vector.load %arg7[%c0_27, %c0_28, %c0_29] : memref<2x8x1xf32, #tpu.memory_space<vmem>>, vector<2x8x1xf32>
    tpu.vector_store %arg7[%c0_27, %c0_28, %c0_29], %10 {strides = array<i32>} : memref<2x8x1xf32, #tpu.memory_space<vmem>>, vector<2x8x1xf32>,
    %c0_i32_30 = arith.constant 0 : i32
    %30 = arith.cmpi eq, %arg2, %c0_i32_30 : i32
    %31 = arith.extui %30 : i1 to i32
    %c0_i32_31 = arith.constant 0 : i32
    %32 = arith.cmpi ne, %31, %c0_i32_31 : i32
    scf.if %32 {
      %c0_32 = arith.constant 0 : index
      %c0_33 = arith.constant 0 : index
      %c0_34 = arith.constant 0 : index
      %33 = vector.load %arg8[%c0_32, %c0_33, %c0_34] : memref<2x8x1xf32, #tpu.memory_space<vmem>>, vector<2x8x1xf32>
      %34 = tpu.reciprocal %33 : vector<2x8x1xf32> -> vector<2x8x1xf32>
      %c0_35 = arith.constant 0 : index
      %c0_36 = arith.constant 0 : index
      %c0_37 = arith.constant 0 : index
      %35 = vector.load %arg9[%c0_35, %c0_36, %c0_37] : memref<2x8x32xf32, #tpu.memory_space<vmem>>, vector<2x8x32xf32>
      %36 = vector.broadcast %34 : vector<2x8x1xf32> to vector<2x8x32xf32>
      %37 = arith.mulf %35, %36 : vector<2x8x32xf32>
      %c0_38 = arith.constant 0 : index
      %c0_39 = arith.constant 0 : index
      %c0_40 = arith.constant 0 : index
      %38 = vector.load %arg6[%c0_38, %c0_39, %c0_40] : memref<2x8x32xf32, #tpu.memory_space<vmem>>, vector<2x8x32xf32>
      tpu.vector_store %arg6[%c0_38, %c0_39, %c0_40], %37 {strides = array<i32>} : memref<2x8x32xf32, #tpu.memory_space<vmem>>, vector<2x8x32xf32>,
    } else {
    }
    return
  }
  func.func @transform_0(%arg0: i32, %arg1: i32, %arg2: i32) -> (i32, i32, i32) {
    %c0_i32 = arith.constant 0 : i32
    %c0_i32_0 = arith.constant 0 : i32
    return %arg0, %arg1, %c0_i32 : i32, i32, i32
  }
  func.func @transform_1(%arg0: i32, %arg1: i32, %arg2: i32) -> (i32, i32, i32) {
    %c0_i32 = arith.constant 0 : i32
    %c0_i32_0 = arith.constant 0 : i32
    return %arg0, %arg2, %c0_i32 : i32, i32, i32
  }
  func.func @transform_2(%arg0: i32, %arg1: i32, %arg2: i32) -> (i32, i32, i32) {
    %c0_i32 = arith.constant 0 : i32
    %c0_i32_0 = arith.constant 0 : i32
    return %arg0, %arg2, %c0_i32 : i32, i32, i32
  }
  func.func @transform_3(%arg0: i32, %arg1: i32, %arg2: i32) -> (i32, i32, i32) {
    %c0_i32 = arith.constant 0 : i32
    %c0_i32_0 = arith.constant 0 : i32
    return %arg0, %arg1, %c0_i32 : i32, i32, i32
  }
}

</mosaic_0001>

<bundles_post_ra>
// kernel: tpu_custom_call.1
= control target key start
LH: loop header
LB: loop body
LE: loop exit
PB: predicated region body
PF: predicated region fallthrough
CT: control target
= control target key end

     0   :  { %8 = vsyncpa [#allocation6], 0  ;;  %s497_s0 = inlined_call_operand.hbm [shape: bf16[2,8,32], index: 0, kind: input, shape index: {}]   ;;  %s498_s1 = inlined_call_operand.hbm [shape: bf16[2,8,32], index: 1, kind: input, shape index: {}]   ;;  %s499_s2 = inlined_call_operand.hbm [shape: bf16[2,8,32], index: 2, kind: input, shape index: {}]   ;;  %s500_s3 = inlined_call_operand.hbm [shape: f32[2,8,32], index: 3, kind: output, shape index: {}]  }
   0x1   :  { %9 = vsyncpa [#allocation9], 0 }
   0x2   :  { %10 = vsyncpa [#allocation7], 0  ;;  %s28_s14 = sshll.u32 %s498_s1, 4  ;;  %s430_s15 = smov [#allocation8]   ;;  %s29_s14 = int_to_ptr.hbm [resolvable:$true] %s28_s14 }
   0x3   :  { %s30_s16 = sshll.u32 %s430_s15, 4  ;;  %s15_s19 = sshll.u32 %s497_s0, 4  ;;  %s31_s16 = int_to_ptr.vmem [resolvable:$true] %s30_s16  ;;  %s16_s19 = int_to_ptr.hbm [resolvable:$true] %s15_s19 }
   0x4   :  { %s431_s20 = smov 64   ;;  %s432_s21 = smov 4  }
   0x5   :  { %36 = dma.hbm_to_vmem [thread:$0]  %s29_s14, 128, %s31_s16, [#allocation9], %s431_s20, %s431_s20, %s432_s21  }
   0x6   :  { %s433_s22 = smov [#allocation5]   ;;  %s41_s26 = sshll.u32 %s499_s2, 4  ;;  %s42_s26 = int_to_ptr.hbm [resolvable:$true] %s41_s26 }
   0x7   :  { %s17_s23 = sshll.u32 %s433_s22, 4  ;;  %s434_s1 = smov [#allocation10]   ;;  %s18_s23 = int_to_ptr.vmem [resolvable:$true] %s17_s23 }
   0x8   :  { %23 = dma.hbm_to_vmem [thread:$0]  %s16_s19, 128, %s18_s23, [#allocation6], %s431_s20, %s431_s20, %s432_s21  }
   0x9   :  { %s43_s27 = sshll.u32 %s434_s1, 4  ;;  %s44_s27 = int_to_ptr.vmem [resolvable:$true] %s43_s27 }
   0xa   :  { %49 = dma.hbm_to_vmem [thread:$0]  %s42_s26, 128, %s44_s27, [#allocation9], %s431_s20, %s431_s20, %s432_s21  }
   0xb   :  { %424 = dma.done.wait [#allocation6], 128  }
   0xc   :  { %425 = vsyncadd [#allocation6], 4294967168 }
   0xd   :  { %426 = dma.done.wait [#allocation9], 256  }
   0xe   :  { %427 = vsyncadd [#allocation9], 4294967040  ;;  %vm72_vm0 = vcmask 261120   ;;  %v77_v0 = vld [vmem:[#allocation8] sm:$0xf]  ;;  %vm67_vm1 = vcmask 7168  }
   0xf   :  { %v78_v1 = vld [vmem:[#allocation8 + $0x4] sm:$0xf]  ;;  %v86_v2 = vsel %vm72_vm0, %v77_v0, 0  ;;  %v75_v4 = vld [vmem:[#allocation5] sm:$0xf]  ;;  %v435_v6 = vmov -inf  }
  0x10   :  { %v105_v3 = vsel %vm72_vm0, %v78_v1, 0  ;;  %95 = vmatpush.bf16.xpose.msra.mxu0 %v86_v2  ;;  %v76_v5 = vld [vmem:[#allocation5 + $0x4] sm:$0xf]  ;;  %68 = vst.msk [vmem:[#allocation2] sm:$0xff] %vm67_vm1, %v435_v6  ;;  %vm122_vm2 = vcmask 64512   ;;  %v436_v13 = vmov 0  }
  0x11   :  { %114 = vmatpush.bf16.xpose.msra.mxu1 %v105_v3  ;;  %69 = vst.msk [vmem:[#allocation2 + $0x8] sm:$0xff] %vm67_vm1, %v435_v6  ;;  %313 = vset.pattern.permute.xlu1 %v436_v13  ;;  %v437_v14 = vmov 0.0   ;;  %v79_v27 = vld [vmem:[#allocation10] sm:$0xf]  ;;  %vm173_vm3 = vcmask 1043456   ;;  %s438_s0 = smov [#allocation11]  }
  0x12   :  { %314 = vset.pattern.permute.xlu0 %v436_v13  ;;  %315 = vset.pattern.permute.xlu2 %v436_v13  ;;  %73 = vst.msk [vmem:[#allocation4] sm:$0xff] %vm72_vm0, %v437_v14  ;;  %v175_v28 = vsel %vm173_vm3, %v79_v27, 0  ;;  %v80_v29 = vld [vmem:[#allocation10 + $0x4] sm:$0xf]  ;;  %s282_s2 = sshll.u32 %s438_s0, 4  ;;  %s284_s30 = sshll.u32 %s500_s3, 4  ;;  %s283_s2 = int_to_ptr.vmem [resolvable:$true] %s282_s2  ;;  %s285_s30 = int_to_ptr.hbm [resolvable:$true] %s284_s30 }
  0x13   :  { %70 = vst.msk [vmem:[#allocation3] sm:$0xff] %vm67_vm1, %v437_v14  ;;  %184 = vmatpush.bf16.msra.mxu2 %v175_v28  ;;  %v194_v30 = vsel %vm173_vm3, %v80_v29, 0  ;;  %s439_s4 = smov 128   ;;  %s440_s5 = smov 8  }
  0x14   :  { %71 = vst.msk [vmem:[#allocation3 + $0x8] sm:$0xff] %vm67_vm1, %v437_v14  ;;  %203 = vmatpush.bf16.msra.mxu3 %v194_v30 }
  0x15   :  { %74 = vst.msk [vmem:[#allocation4 + $0x8] sm:$0xff] %vm72_vm0, %v437_v14 }
  0x17   :  { %298 = vmatmul.msk.bf16.vlgmr.msra.gmra.mxu0 %vm72_vm0, %v75_v4  ;;  %v120_v15 = vld [vmem:[#allocation2] sm:$0xff] }
  0x18   :  { %299 = vmatmul.msk.bf16.vlgmr.msra.gmra.mxu1 %vm72_vm0, %v76_v5  ;;  %v121_v20 = vld [vmem:[#allocation2 + $0x8] sm:$0xff] }
  0x19   :  { %v209_v52 = vld [vmem:[#allocation4] sm:$0xff] }
  0x1a   :  { %v153_v43 = vld [vmem:[#allocation3] sm:$0xff] }
  0x1b   :  { %v154_v47 = vld [vmem:[#allocation3 + $0x8] sm:$0xff] }
  0x1c   :  { %v210_v61 = vld [vmem:[#allocation4 + $0x8] sm:$0xff] }
  0x94   :  { %v97_v7 = vpop.f32.mrf.mxu0 }
  0x95   :  { %v116_v8 = vpop.f32.mrf.mxu1  ;;  %v123_v9 = vsel %vm122_vm2, %v97_v7, -inf }
  0x96   :  { %124 = vmax.xlane.f32.xlu0 %v123_v9  ;;  %v126_v10 = vsel %vm122_vm2, %v116_v8, -inf }
  0x9c   :  { %v99_v11 = vpop.f32.mrf.mxu0 }
  0x9d   :  { %v118_v12 = vpop.f32.mrf.mxu1 }
  0x9e   :  { %127 = vmax.xlane.f32.xlu0 %v126_v10 }
 0x109   :  { %v125_v16 = vpop.xlane.xlu0 %124 }
 0x10a   :  { %v129_v17 = vmax.f32 %v120_v15, %v125_v16 }
 0x10c   :  { %v131_v18 = vsub.f32 %v120_v15, %v129_v17  ;;  %227 = vst.msk [vmem:[#allocation2] sm:$0xff] %vm67_vm1, %v129_v17  ;;  %139 = vperm.xlu1 %313, %v129_v17  }
 0x10e   :  { %v133_v19 = vmul.f32 1.442695, %v131_v18 }
 0x110   :  { %316 = vpow2.f32 %v133_v19 }
 0x111   :  { %v128_v21 = vpop.xlane.xlu0 %127 }
 0x112   :  { %v130_v22 = vmax.f32 %v121_v20, %v128_v21 }
 0x114   :  { %v132_v23 = vsub.f32 %v121_v20, %v130_v22  ;;  %228 = vst.msk [vmem:[#allocation2 + $0x8] sm:$0xff] %vm67_vm1, %v130_v22  ;;  %144 = vperm.xlu1 %313, %v130_v22  }
 0x116   :  { %v317_v24 = vpop.eup %316  ;;  %v135_v25 = vmul.f32 1.442695, %v132_v23 }
 0x117   :  { %213 = vperm.xlu0 %314, %v317_v24   ;;  %v155_v44 = vmul.f32 %v317_v24, %v153_v43 }
 0x118   :  { %318 = vpow2.f32 %v135_v25 }
 0x11e   :  { %v319_v26 = vpop.eup %318 }
 0x11f   :  { %218 = vperm.xlu1 %313, %v319_v26   ;;  %v156_v48 = vmul.f32 %v319_v26, %v154_v47 }
 0x17e   :  { %v140_v31 = vpop.permute.xlu1 %139 }
 0x17f   :  { %v147_v32 = vsub.f32 %v97_v7, %v140_v31 }
 0x181   :  { %v149_v33 = vmul.f32 1.442695, %v147_v32 }
 0x183   :  { %320 = vpow2.f32 %v149_v33 }
 0x186   :  { %v145_v34 = vpop.permute.xlu1 %144 }
 0x187   :  { %v148_v35 = vsub.f32 %v116_v8, %v145_v34 }
 0x189   :  { %v321_v36 = vpop.eup %320  ;;  %v151_v37 = vmul.f32 1.442695, %v148_v35  ;;  %v214_v53 = vpop.permute.xlu0 %213 }
 0x18a   :  { %v157_v38 = vsel %vm122_vm2, %v321_v36, 0.0  ;;  %v168_v39 = vpack.c.bf16 %v321_v36, %v321_v36  ;;  %v221_v54 = vmul.f32 %v214_v53, %v209_v52 }
 0x18b   :  { %322 = vpow2.f32 %v151_v37  ;;  %158 = vadd.xlane.f32.xlu2 %v157_v38 }
 0x18c   :  { %300 = vmatmul.msk.bf16.vlgmr.msra.gmra.mxu2 %vm122_vm2, %v168_v39 }
 0x191   :  { %v323_v40 = vpop.eup %322  ;;  %v219_v62 = vpop.permute.xlu1 %218 }
 0x192   :  { %v160_v41 = vsel %vm122_vm2, %v323_v40, 0.0  ;;  %v169_v42 = vpack.c.bf16 %v323_v40, %v323_v40  ;;  %v222_v2 = vmul.f32 %v219_v62, %v210_v61 }
 0x193   :  { %161 = vadd.xlane.f32.xlu2 %v160_v41 }
 0x194   :  { %301 = vmatmul.msk.bf16.vlgmr.msra.gmra.mxu3 %vm122_vm2, %v169_v42 }
 0x1fe   :  { %v159_v45 = vpop.xlane.xlu2 %158 }
 0x1ff   :  { %v163_v46 = vadd.f32 %v159_v45, %v155_v44 }
 0x201   :  { %166 = vst.msk [vmem:[#allocation3] sm:$0xff] %vm67_vm1, %v163_v46 }
 0x206   :  { %v162_v49 = vpop.xlane.xlu2 %161 }
 0x207   :  { %v164_v50 = vadd.f32 %v162_v49, %v156_v48 }
 0x208   :  { %v232_v51 = vld [vmem:[#allocation3] sm:$0xff] }
 0x209   :  { %167 = vst.msk [vmem:[#allocation3 + $0x8] sm:$0xff] %vm67_vm1, %v164_v50  ;;  %324 = vrcp.f32 %v232_v51  ;;  %v245_v63 = vand.u32 2147483648, %v232_v51  ;;  %v243_v1 = vand.u32 2147483647, %v232_v51  ;;  %vm239_vm5 = vweird.f32 %v232_v51 }
 0x20b   :  { %v246_v7 = vor.u32 1.1754944e-38, %v245_v63  ;;  %vm244_vm7 = vcmp.eq.f32.partialorder %v243_v1, 8.507059e+37 }
 0x20f   :  { %v325_v55 = vpop.eup %324  ;;  %v186_v56 = vpop.f32.mrf.mxu2 }
 0x210   :  { %v223_v57 = vadd.f32 %v221_v54, %v186_v56  ;;  %v235_v58 = vmul.f32 %v325_v55, %v232_v51  ;;  %v233_v59 = vld [vmem:[#allocation3 + $0x8] sm:$0xff]  ;;  %vm240_vm4 = vweird.f32 %v325_v55 }
 0x211   :  { %326 = vrcp.f32 %v233_v59  ;;  %vm241_vm6 = vmor %vm239_vm5, %vm240_vm4  ;;  %v259_v13 = vand.u32 2147483648, %v233_v59  ;;  %v257_v15 = vand.u32 2147483647, %v233_v59  ;;  %vm253_vm9 = vweird.f32 %v233_v59 }
 0x212   :  { %225 = vst.msk [vmem:[#allocation4] sm:$0xff] %vm72_vm0, %v223_v57  ;;  %v236_v60 = vsub.f32 1.0, %v235_v58 }
 0x213   :  { %v260_v18 = vor.u32 1.1754944e-38, %v259_v13  ;;  %vm258_vm11 = vcmp.eq.f32.partialorder %v257_v15, 8.507059e+37 }
 0x214   :  { %v237_v0 = vmul.f32 %v325_v55, %v236_v60 }
 0x216   :  { %v238_v3 = vadd.f32 %v325_v55, %v237_v0 }
 0x217   :  { %v327_v4 = vpop.eup %326  ;;  %v188_v5 = vpop.f32.mrf.mxu2 }
 0x218   :  { %v205_v6 = vpop.f32.mrf.mxu3  ;;  %v242_v9 = vsel %vm241_vm6, %v325_v55, %v238_v3  ;;  %v249_v10 = vmul.f32 %v327_v4, %v233_v59  ;;  %vm254_vm8 = vweird.f32 %v327_v4 }
 0x219   :  { %v224_v8 = vadd.f32 %v222_v2, %v205_v6  ;;  %v247_v11 = vsel %vm244_vm7, %v246_v7, %v242_v9  ;;  %vm255_vm10 = vmor %vm253_vm9, %vm254_vm8  ;;  %v262_v21 = vld [vmem:[#allocation4] sm:$0xff] }
 0x21a   :  { %266 = vperm.xlu2 %315, %v247_v11   ;;  %v250_v12 = vsub.f32 1.0, %v249_v10 }
 0x21b   :  { %226 = vst.msk [vmem:[#allocation4 + $0x8] sm:$0xff] %vm72_vm0, %v224_v8 }
 0x21c   :  { %v251_v14 = vmul.f32 %v327_v4, %v250_v12 }
 0x21e   :  { %v252_v16 = vadd.f32 %v327_v4, %v251_v14 }
 0x220   :  { %v207_v17 = vpop.f32.mrf.mxu3  ;;  %v256_v19 = vsel %vm255_vm10, %v327_v4, %v252_v16 }
 0x221   :  { %v261_v20 = vsel %vm258_vm11, %v260_v18, %v256_v19 }
 0x222   :  { %271 = vperm.xlu1 %313, %v261_v20   ;;  %v263_v24 = vld [vmem:[#allocation4 + $0x8] sm:$0xff] }
 0x274   :  { %v267_v22 = vpop.permute.xlu2 %266 }
 0x275   :  { %v274_v23 = vmul.f32 %v267_v22, %v262_v21 }
 0x277   :  { %276 = vst.msk [vmem:[#allocation11] sm:$0xff] %vm72_vm0, %v274_v23 }
 0x294   :  { %v272_v25 = vpop.permute.xlu1 %271 }
 0x295   :  { %v275_v26 = vmul.f32 %v272_v25, %v263_v24 }
 0x297   :  { %277 = vst.msk [vmem:[#allocation11 + $0x8] sm:$0xff] %vm72_vm0, %v275_v26 }
 0x298   :  { %290 = dma.vmem_to_hbm [thread:$0]  %s283_s2, 256, %s285_s30, [#allocation7], %s439_s4, %s439_s4, %s440_s5  }
 0x299   :  { %428 = dma.done.wait [#allocation7], 256  }
 0x29a   :  { %429 = vsyncadd [#allocation7], 4294967040 }
 0x29b   :  { %295 = vsyncpa [#allocation6], 1 }
 0x29c   :  { %296 = vsyncpa [#allocation9], 1 }
 0x29d   :  { %297 = vsyncpa [#allocation7], 1 }

</bundles_post_ra>
